<compile_context>
chip_gen: v7x
topology: tpu7x:2x2x1
jax: 0.10.0
libtpu: 0.0.40
codegen_flags: <defaults>
</compile_context>

<pallas_src>
import functools

import jax
import jax.numpy as jnp
from jax.experimental import pallas as pl
from jax.experimental.pallas import tpu as pltpu


def _label_smoothing_kernel(out_ref, tgt_ref, partial_ref, *,
                            total_rows, tile_rows, need_mask):
    """One (tb, C) batch tile.

    out_ref     : VMEM (tb, C) logits tile
    tgt_ref     : VMEM (tb, C) soft-target tile
    partial_ref : VMEM (1, 8, 128) f32, this tile's own output block:
                    [0, 0, 0] = sum_tile( t * log_softmax(x) )
                    [0, 0, 1] = sum_tile( log_softmax(x) )
                    everything else = 0
    """
    x = out_ref[...].astype(jnp.float32)          # (tb, C)
    t = tgt_ref[...].astype(jnp.float32)          # (tb, C)
    num_classes = x.shape[1]

    # Max-shifted logits; m cancels exactly in log_softmax so working on
    # x' = x - m and z' = logsumexp(x) - m is both more accurate (no
    # cancellation from a large common offset) and lets the compiler drop x.
    m = jnp.max(x, axis=1, keepdims=True)                      # (tb, 1)  XLU
    xs = x - m                                                 # (tb, C)
    zr = jnp.log(jnp.sum(jnp.exp(xs), axis=1, keepdims=True))  # (tb, 1)  z' = lse - m

    # Fused per-row partial sums (each a single pass over the tile):
    #   log_softmax(x)[r, c] = xs[r, c] - z'_r    (never materialized)
    sx = jnp.sum(xs, axis=1, keepdims=True)                    # (tb, 1) sum_c x'
    stx = jnp.sum(t * xs, axis=1, keepdims=True)               # (tb, 1) sum_c t*x'
    st = jnp.sum(t, axis=1, keepdims=True)                     # (tb, 1) sum_c t

    row_t = stx - st * zr                 # sum_c t * log_softmax        (tb, 1)
    row_u = sx - num_classes * zr         # sum_c log_softmax            (tb, 1)

    if need_mask:
        # Zero out padded rows (row index >= real batch size).
        i = pl.program_id(0)
        ridx = jax.lax.broadcasted_iota(jnp.int32, (tile_rows, 1), 0) + i * tile_rows
        mask = (ridx < total_rows).astype(jnp.float32)
        row_t = row_t * mask
        row_u = row_u * mask

    s_t = jnp.sum(row_t)
    s_u = jnp.sum(row_u)

    # Pack the two scalars into lanes 0/1 of a lane-dense (1, 8, 128) slab.
    sub = jax.lax.broadcasted_iota(jnp.int32, partial_ref.shape, 1)
    lane = jax.lax.broadcasted_iota(jnp.int32, partial_ref.shape, 2)
    partial_ref[...] = jnp.where(
        (sub == 0) & (lane == 0), s_t,
        jnp.where((sub == 0) & (lane == 1), s_u, 0.0),
    )


def _vmem_capacity_bytes():
    """Physical VMEM per TensorCore; conservative (v7x) default if unknown."""
    try:
        info = pltpu.get_tpu_info()
        cap = getattr(info, "vmem_capacity_bytes", None)
        if cap:
            return int(cap)
    except Exception:
        pass
    return 64 * 1024 * 1024


def _pick_tiling(B, C, out_dtype, tgt_dtype, budget_bytes):
    """Choose (tb, num_tiles, padded_B).

    Footprint model per grid step (what actually sits in VMEM):
      * 2 pipeline buffers per input tile               -> 2 * C * (io + it)
      * ~4 full-tile f32 temporaries (x', exp, t*x', t) -> 4 * C * 4
    so tb <= budget / (C * (2*(io+it) + 16)), rounded down to a sublane
    multiple, and also capped so the grid has >= 2 tiles (both v7x TCs busy).
    """
    io = jnp.dtype(out_dtype).itemsize
    it = jnp.dtype(tgt_dtype).itemsize
    sublane = 16 if min(io, it) < 4 else 8
    bytes_per_row = C * (2 * (io + it) + 4 * 4)
    cap = max(sublane, (budget_bytes // max(1, bytes_per_row)) // sublane * sublane)

    if B < 2 * sublane:
        # Too small to split into aligned tiles: one full-array tile
        # (block_shape == full dims is always legal, no padding needed).
        return B, 1, B

    half_aligned = -(-(-(-B // 2)) // sublane) * sublane   # round_up(cdiv(B,2), sublane)
    tb = min(cap, half_aligned)
    num_tiles = -(-B // tb)
    padded_B = num_tiles * tb
    return tb, num_tiles, padded_B


def label_smoothing(outputs, targets, smooth):
    """Pallas-TPU LabelSmoothing.forward.  outputs, targets: (B, C). Returns f32 scalar."""
    B, C = outputs.shape
    assert targets.shape == (B, C)

    vmem_cap = _vmem_capacity_bytes()
    # Scoped limit: half of physical VMEM, clamped to [32, 64] MiB
    # (-> 32 MiB on v7x, 64 MiB on v5e/v6e).
    vmem_limit = max(32 * 1024 * 1024, min(vmem_cap // 2, 64 * 1024 * 1024))
    budget = (vmem_limit * 3) // 4          # headroom for output blocks / misc

    tb, num_tiles, padded_B = _pick_tiling(B, C, outputs.dtype, targets.dtype, budget)
    need_mask = padded_B != B
    if need_mask:
        pad = padded_B - B
        outputs = jnp.pad(outputs, ((0, pad), (0, 0)))
        targets = jnp.pad(targets, ((0, pad), (0, 0)))

    kernel = functools.partial(
        _label_smoothing_kernel,
        total_rows=B, tile_rows=tb, need_mask=need_mask)

    partials = pl.pallas_call(
        kernel,
        out_shape=jax.ShapeDtypeStruct((num_tiles, 8, 128), jnp.float32),
        grid=(num_tiles,),
        in_specs=[
            pl.BlockSpec((tb, C), lambda i: (i, 0)),       # logits tile
            pl.BlockSpec((tb, C), lambda i: (i, 0)),       # soft-target tile
        ],
        out_specs=pl.BlockSpec((1, 8, 128), lambda i: (i, 0, 0)),
        compiler_params=pltpu.CompilerParams(
            dimension_semantics=("parallel",),   # independent tiles -> 2-TC on v7x
            vmem_limit_bytes=vmem_limit,
        ),
    )(outputs, targets)

    # Final reduce + all uniform scaling (smooth, 1/B, 1/C) done once here.
    s_t = jnp.sum(partials[:, 0, 0])   # sum( targets * log_softmax(outputs) )
    s_u = jnp.sum(partials[:, 0, 1])   # sum( log_softmax(outputs) )
    loss_ce = -s_t / B
    loss_u = -s_u / (B * C)
    return (1.0 - smooth) * loss_ce + smooth * loss_u


def _reference(outputs, targets, smooth):
    ls = jax.nn.log_softmax(outputs.astype(jnp.float32), axis=1)
    B, C = outputs.shape
    u = jnp.ones_like(ls) / C
    loss_ce = -(ls * targets.astype(jnp.float32)).sum() / B
    loss_u = -(ls * u).sum() / B
    return (1.0 - smooth) * loss_ce + smooth * loss_u


if __name__ == "__main__":
    key = jax.random.PRNGKey(0)
    k1, k2 = jax.random.split(key)
    smooth = 0.1

    # Case 1: divisible batch (2 aligned tiles, no masking path).
    B, C = 32, 128
    outputs = jax.random.normal(k1, (B, C), dtype=jnp.float32)
    raw = jax.random.uniform(k2, (B, C), dtype=jnp.float32)
    targets = raw / jnp.sum(raw, axis=1, keepdims=True)   # soft labels, rows sum to 1

    loss = jax.block_until_ready(label_smoothing(outputs, targets, smooth))
    ref = _reference(outputs, targets, smooth)
    assert jnp.allclose(loss, ref, rtol=1e-5, atol=1e-5), (loss, ref)

    # Case 2: non-divisible batch (exercises padding + in-kernel row mask).
    B2 = 19
    outputs2 = outputs[:B2] + 100.0   # large common offset: shifted-logit precision path
    targets2 = targets[:B2]
    loss2 = jax.block_until_ready(label_smoothing(outputs2, targets2, smooth))
    ref2 = _reference(outputs2, targets2, smooth)
    assert jnp.allclose(loss2, ref2, rtol=1e-5, atol=1e-5), (loss2, ref2)

    print("KERNEL_OK")
</pallas_src>

<mosaic_0001>
module attributes {stable_mosaic.version = 11 : i64} {
  func.func @_label_smoothing_kernel(%arg0: i32, %arg1: memref<16x128xf32, #tpu.memory_space<vmem>>, %arg2: memref<16x128xf32, #tpu.memory_space<vmem>>, %arg3: memref<1x8x128xf32, #tpu.memory_space<vmem>>) attributes {dimension_semantics = [#tpu.dimension_semantics<parallel>], iteration_bounds = array<i64: 2>, scalar_prefetch = 0 : i64, scratch_operands = 0 : i64, tpu.core_type = #tpu.core_type<tc>, window_params = [{transform_indices = @transform_0, window_bounds = array<i64: 16, 128>}, {transform_indices = @transform_1, window_bounds = array<i64: 16, 128>}, {transform_indices = @transform_2, window_bounds = array<i64: 1, 8, 128>}]} {
    %c0 = arith.constant 0 : index
    %c0_0 = arith.constant 0 : index
    %0 = vector.load %arg1[%c0, %c0_0] : memref<16x128xf32, #tpu.memory_space<vmem>>, vector<16x128xf32>
    %c0_1 = arith.constant 0 : index
    %c0_2 = arith.constant 0 : index
    %1 = vector.load %arg2[%c0_1, %c0_2] : memref<16x128xf32, #tpu.memory_space<vmem>>, vector<16x128xf32>
    %cst = arith.constant dense<0xFF800000> : vector<16xf32>
    %2 = vector.multi_reduction <maximumf>, %0, %cst [1] : vector<16x128xf32> to vector<16xf32>
    %3 = vector.shape_cast %2 : vector<16xf32> to vector<16x1xf32>
    %4 = vector.broadcast %3 : vector<16x1xf32> to vector<16x128xf32>
    %5 = arith.subf %0, %4 : vector<16x128xf32>
    %6 = math.exp %5 : vector<16x128xf32>
    %cst_3 = arith.constant dense<0.000000e+00> : vector<16xf32>
    %7 = vector.multi_reduction <add>, %6, %cst_3 [1] : vector<16x128xf32> to vector<16xf32>
    %8 = vector.shape_cast %7 : vector<16xf32> to vector<16x1xf32>
    %9 = math.log %8 : vector<16x1xf32>
    %cst_4 = arith.constant dense<0.000000e+00> : vector<16xf32>
    %10 = vector.multi_reduction <add>, %5, %cst_4 [1] : vector<16x128xf32> to vector<16xf32>
    %11 = vector.shape_cast %10 : vector<16xf32> to vector<16x1xf32>
    %12 = arith.mulf %1, %5 : vector<16x128xf32>
    %cst_5 = arith.constant dense<0.000000e+00> : vector<16xf32>
    %13 = vector.multi_reduction <add>, %12, %cst_5 [1] : vector<16x128xf32> to vector<16xf32>
    %14 = vector.shape_cast %13 : vector<16xf32> to vector<16x1xf32>
    %cst_6 = arith.constant dense<0.000000e+00> : vector<16xf32>
    %15 = vector.multi_reduction <add>, %1, %cst_6 [1] : vector<16x128xf32> to vector<16xf32>
    %16 = vector.shape_cast %15 : vector<16xf32> to vector<16x1xf32>
    %17 = arith.mulf %16, %9 : vector<16x1xf32>
    %18 = arith.subf %14, %17 : vector<16x1xf32>
    %cst_7 = arith.constant 1.280000e+02 : f32
    %19 = vector.broadcast %cst_7 : f32 to vector<16x1xf32>
    %20 = arith.mulf %19, %9 : vector<16x1xf32>
    %21 = arith.subf %11, %20 : vector<16x1xf32>
    %22 = vector.shape_cast %18 : vector<16x1xf32> to vector<1x16x1xf32>
    %cst_8 = arith.constant dense<0.000000e+00> : vector<1xf32>
    %23 = vector.multi_reduction <add>, %22, %cst_8 [1, 2] : vector<1x16x1xf32> to vector<1xf32>
    %24 = vector.shape_cast %23 : vector<1xf32> to vector<1x1x1xf32>
    %25 = vector.extract %24[0, 0, 0] : f32 from vector<1x1x1xf32>
    %26 = vector.shape_cast %21 : vector<16x1xf32> to vector<1x16x1xf32>
    %cst_9 = arith.constant dense<0.000000e+00> : vector<1xf32>
    %27 = vector.multi_reduction <add>, %26, %cst_9 [1, 2] : vector<1x16x1xf32> to vector<1xf32>
    %28 = vector.shape_cast %27 : vector<1xf32> to vector<1x1x1xf32>
    %29 = vector.extract %28[0, 0, 0] : f32 from vector<1x1x1xf32>
    %30 = tpu.iota {dimensions = array<i32: 1>} : vector<1x8x128xi32>
    %31 = tpu.iota {dimensions = array<i32: 2>} : vector<1x8x128xi32>
    %c0_i32 = arith.constant 0 : i32
    %32 = vector.broadcast %c0_i32 : i32 to vector<1x8x128xi32>
    %33 = arith.cmpi eq, %30, %32 : vector<1x8x128xi32>
    %c0_i32_10 = arith.constant 0 : i32
    %34 = vector.broadcast %c0_i32_10 : i32 to vector<1x8x128xi32>
    %35 = arith.cmpi eq, %31, %34 : vector<1x8x128xi32>
    %36 = arith.andi %33, %35 : vector<1x8x128xi1>
    %c0_i32_11 = arith.constant 0 : i32
    %37 = vector.broadcast %c0_i32_11 : i32 to vector<1x8x128xi32>
    %38 = arith.cmpi eq, %30, %37 : vector<1x8x128xi32>
    %c1_i32 = arith.constant 1 : i32
    %39 = vector.broadcast %c1_i32 : i32 to vector<1x8x128xi32>
    %40 = arith.cmpi eq, %31, %39 : vector<1x8x128xi32>
    %41 = arith.andi %38, %40 : vector<1x8x128xi1>
    %cst_12 = arith.constant 0.000000e+00 : f32
    %42 = vector.broadcast %29 : f32 to vector<1x8x128xf32>
    %43 = vector.broadcast %cst_12 : f32 to vector<1x8x128xf32>
    %44 = arith.select %41, %42, %43 : vector<1x8x128xi1>, vector<1x8x128xf32>
    %45 = vector.broadcast %25 : f32 to vector<1x8x128xf32>
    %46 = arith.select %36, %45, %44 : vector<1x8x128xi1>, vector<1x8x128xf32>
    %c0_13 = arith.constant 0 : index
    %c0_14 = arith.constant 0 : index
    %c0_15 = arith.constant 0 : index
    %47 = vector.load %arg3[%c0_13, %c0_14, %c0_15] : memref<1x8x128xf32, #tpu.memory_space<vmem>>, vector<1x8x128xf32>
    tpu.vector_store %arg3[%c0_13, %c0_14, %c0_15], %46 {strides = array<i32>} : memref<1x8x128xf32, #tpu.memory_space<vmem>>, vector<1x8x128xf32>,
    return
  }
  func.func @transform_0(%arg0: i32) -> (i32, i32) {
    %c0_i32 = arith.constant 0 : i32
    %c0_i32_0 = arith.constant 0 : i32
    return %arg0, %c0_i32 : i32, i32
  }
  func.func @transform_1(%arg0: i32) -> (i32, i32) {
    %c0_i32 = arith.constant 0 : i32
    %c0_i32_0 = arith.constant 0 : i32
    return %arg0, %c0_i32 : i32, i32
  }
  func.func @transform_2(%arg0: i32) -> (i32, i32, i32) {
    %c0_i32 = arith.constant 0 : i32
    %c0_i32_0 = arith.constant 0 : i32
    %c0_i32_1 = arith.constant 0 : i32
    return %arg0, %c0_i32, %c0_i32_0 : i32, i32, i32
  }
}

</mosaic_0001>

<bundles_post_ra>
// kernel: tpu_custom_call.1
= control target key start
LH: loop header
LB: loop body
LE: loop exit
PB: predicated region body
PF: predicated region fallthrough
CT: control target
= control target key end

     0   :  { %7 = vsyncpa [#allocation3], 0  ;;  %s852_s0 = inlined_call_operand.hbm [shape: f32[32,128], index: 0, kind: input, shape index: {}]   ;;  %s853_s1 = inlined_call_operand.hbm [shape: f32[32,128], index: 1, kind: input, shape index: {}]   ;;  %s854_s2 = inlined_call_operand.hbm [shape: f32[2,8,128], index: 2, kind: output, shape index: {}]  }
   0x1   :  { %9 = vsyncpa [#allocation3 + $0x1], 0 }
   0x2   :  { %10 = vsyncpa [#allocation6], 0 }
   0x3   :  { %12 = vsyncpa [#allocation6 + $0x1], 0 }
   0x4   :  { %13 = vsyncpa [#allocation4], 0 }
   0x5   :  { %15 = vsyncpa [#allocation4 + $0x1], 0  ;;  %s630_s9 = smov 0   ;;  %s632_s10 = smov 0  }
   0x6   :  { %s634_s11 = smov 0   ;;  %s636_s12 = smov 0  }
   0x7 LB: > { %s651_s13 = sadd.s32 4294967295, %s608_s12   ;;  %s394_s14 = sadd.s32 4294967294, %s608_s12   ;;  %s608_s12 = sphi %s636_s12, %s870_s12   ;;  %s604_s11 = sphi %s634_s11, %s869_s11   ;;  %s600_s10 = sphi %s632_s10, %s868_s10   ;;  %s596_s9 = sphi %s630_s9, %s867_s9  }
   0x8   : > { %s655_s15 = sadd.s32 1, %s608_s12   ;;  %s28_s16 = sadd.s32 1, %s604_s11 }
   0x9   : > { %s25_s17 = ssub.s32 %s608_s12, %s655_s15  ;;  %p35_p0 = scmp.ne.s32.totalorder %s604_s11, %s600_s10 }
   0xa   : > { %p26_p1 = scmp.eq.s32.totalorder %s25_s17, 0  ;;  %p36_p2 = scmp.eq.s32.totalorder %s608_s12, 0 }
   0xb   : > { %p41_p3 = scmp.ne.s32.totalorder %s600_s10, %s596_s9  ;;  %p42_p4 = scmp.eq.s32.totalorder %s651_s13, 0 }
   0xc   : > { %s667_s18 = scalar_select %p26_p1, %s604_s11, %s28_s16  }
   0xd   : > { %p669_p5 = por %p36_p2, %p35_p0  ;;  %p673_p6 = por %p42_p4, %p41_p3 }
   0xe   : > { %p91_p7 = scmp.eq.s32.totalorder %s651_s13, 1  ;;  %p97_p8 = scmp.eq.s32.totalorder %s394_s14, 1 }
   0xf   : > { %s858_s20 = scalar_select %p673_p6, 1, 0 }
  0x10   : > { %p434_p10 = scmp.lt.s32.totalorder %s608_s12, 2  ;;  %p680_p11 = por %p91_p7, %p35_p0 }
  0x11   : > { %p684_p12 = por %p97_p8, %p41_p3  ;;  %s689_s23 = sand.u32 1, %s604_s11  }
  0x12   : > { %s859_s21 = scalar_select %p680_p11, 1, 0 }
  0x13   : > { %s860_s22 = scalar_select %p684_p12, 1, 0 }
  0x14   : > { %s411_s24 = sshll.u32 %s608_s12, 8  ;;  %s397_s25 = sshll.u32 %s689_s23, 4 }
  0x15   : > { %s698_s28 = scalar_lea.hbm %s852_s0, %s411_s24  ;;  %s121_s29 = scalar_lea.vmem [#allocation2], %s397_s25 }
  0x16   : > { %s128_s30 = sshll.u32 %s121_s29, 4  ;;  %p704_p13 = pnand %p434_p10, %p669_p5  ;;  %s708_s30 = int_to_ptr.vmem [resolvable:$true] %s128_s30 }
  0x17   : > { %s118_s4 = scalar_lea.sflag [#allocation3], %s689_s23  ;;  %s478_s5 = scalar_lea.hbm %s698_s28, 256 }
  0x18   : > { %p479_p0 = scmp.ne.s32.totalorder %s698_s28, %s478_s5  ;;  %p480_p1 = pneg %p704_p13 }
  0x19   : > { %s483_s8 = scalar_lea.hbm %s852_s0, 512  ;;  %p484_p4 = scmp.lt.u32.totalorder %s698_s28, %s852_s0 }
  0x1a   : > { %p481_p2 = pnand %p480_p1, %p479_p0  ;;  %p485_p5 = scmp.lt.u32.totalorder %s483_s8, %s478_s5 }
  0x1b   : > { %p487_p8 = scmp.lt.u32.totalorder %s478_s5, %s698_s28 }
  0x1c   : > { %p482_p3 = pneg %p481_p2  ;;  %p486_p7 = por %p485_p5, %p484_p4 }
  0x1e   : > { %p488_p10 = por %p487_p8, %p486_p7 }
  0x20   : > { %p489_p9 = pnand %p488_p10, %p482_p3 }
  0x22   : > { %492 = shalt.err (!%p489_p9)
}
  0x23   : > { %s493_s17 = scalar_lea.vmem %s708_s30, 256  ;;  %s610_s19 = smov [#allocation2]  }
  0x24   : > { %p494_p0 = scmp.ne.s32.totalorder %s708_s30, %s493_s17  ;;  %s498_s26 = sshll.u32 %s610_s19, 4  ;;  %s499_s26 = int_to_ptr.vmem [resolvable:$false] %s498_s26 }
  0x25   : > { %s500_s27 = scalar_lea.vmem %s499_s26, 512  ;;  %p501_p11 = scmp.lt.s32.totalorder %s708_s30, %s499_s26 }
  0x26   : > { %p496_p2 = pnand %p494_p0, %p480_p1  ;;  %p502_p4 = scmp.lt.s32.totalorder %s500_s27, %s493_s17 }
  0x28   : > { %p497_p12 = pneg %p496_p2  ;;  %p503_p5 = por %p502_p4, %p501_p11 }
  0x2a   : > { %p504_p7 = pnand %p503_p5, %p497_p12 }
  0x2c   : > { %507 = shalt.err (!%p504_p7)
}
  0x2d   : > { %s611_s29 = smov 128   ;;  %s612_s5 = smov 8  }
  0x2e   : > { %426 = dma.hbm_to_vmem [thread:$0]  (!%p704_p13), %s698_s28, 256, %s708_s30, %s118_s4, %s611_s29, %s611_s29, %s612_s5  }
  0x2f   : > { %p403_p9 = scmp.ge.s32.totalorder %s608_s12, 1  ;;  %p157_p11 = scmp.lt.s32.totalorder %s608_s12, 3 }
  0x30   : > { %s752_s14 = scalar_lea.hbm %s853_s1, %s411_s24  ;;  %s142_s16 = scalar_lea.vmem [#allocation5], %s397_s25 }
  0x31   : > { %p743_p12 = pnand %p403_p9, %p157_p11  ;;  %s149_s17 = sshll.u32 %s142_s16, 4  ;;  %s756_s17 = int_to_ptr.vmem [resolvable:$true] %s149_s17 }
  0x32   : > { %s139_s28 = scalar_lea.sflag [#allocation6], %s689_s23  ;;  %s508_s30 = scalar_lea.hbm %s752_s14, 256 }
  0x33   : > { %p509_p3 = scmp.ne.s32.totalorder %s752_s14, %s508_s30  ;;  %s513_s24 = scalar_lea.hbm %s853_s1, 512 }
  0x34   : > { %p514_p0 = scmp.lt.u32.totalorder %s752_s14, %s853_s1  ;;  %p515_p2 = scmp.lt.u32.totalorder %s513_s24, %s508_s30 }
  0x35   : > { %p511_p8 = pnand %p509_p3, %p480_p1  ;;  %p517_p5 = scmp.lt.u32.totalorder %s508_s30, %s752_s14 }
  0x36   : > { %p516_p4 = por %p515_p2, %p514_p0 }
  0x37   : > { %p512_p10 = pneg %p511_p8 }
  0x38   : > { %p518_p7 = por %p517_p5, %p516_p4 }
  0x3a   : > { %p519_p9 = pnand %p518_p7, %p512_p10 }
  0x3c   : > { %522 = shalt.err (!%p519_p9)
}
  0x3d   : > { %s523_s25 = scalar_lea.vmem %s756_s17, 256  ;;  %s613_s7 = smov [#allocation5]  }
  0x3e   : > { %p524_p11 = scmp.ne.s32.totalorder %s756_s17, %s523_s25  ;;  %s528_s8 = sshll.u32 %s613_s7, 4  ;;  %s529_s8 = int_to_ptr.vmem [resolvable:$false] %s528_s8 }
  0x3f   : > { %s530_s16 = scalar_lea.vmem %s529_s8, 512  ;;  %p531_p6 = scmp.lt.s32.totalorder %s756_s17, %s529_s8 }
  0x40   : > { %p526_p3 = pnand %p524_p11, %p480_p1  ;;  %p532_p0 = scmp.lt.s32.totalorder %s530_s16, %s523_s25 }
  0x42   : > { %p527_p8 = pneg %p526_p3  ;;  %p533_p2 = por %p532_p0, %p531_p6 }
  0x44   : > { %p534_p4 = pnand %p533_p2, %p527_p8 }
  0x46   : > { %537 = shalt.err (!%p534_p4)
}
  0x47   : > { %429 = dma.hbm_to_vmem [thread:$0]  (!%p704_p13), %s752_s14, 256, %s756_s17, %s139_s28, %s611_s29, %s611_s29, %s612_s5  }
  0x48   : > { %161 = sbr.rel (%p743_p12) target bundleno = 628 (0x274), region = 28  ;;  %s790_s30 = sand.u32 (!%p743_p12), 1, %s600_s10  }
  0x49   : > { %s404_s4 = sshll.u32 (!%p743_p12), %s790_s30, 4  ;;  %s164_s19 = scalar_lea.sflag (!%p743_p12), [#allocation3], %s790_s30 }
  0x4a   : > { %s167_s3 = scalar_lea.vmem (!%p743_p12), [#allocation2], %s404_s4  ;;  %p863_p6 = scmp.ne.s32.totalorder (!%p743_p12), %s858_s20, 0 }
  0x4f   : > { %583 = dma.done.wait (%p863_p6), %s164_s19, 256  }
  0x50   : > { %585 = vsyncadd (%p863_p6), %s164_s19, 4294967040  ;;  %s173_s23 = scalar_lea.sflag [#allocation6], %s790_s30  ;;  %s176_s29 = scalar_lea.vmem [#allocation5], %s404_s4 }
  0x51   : > { %587 = dma.done.wait (%p863_p6), %s173_s23, 256  }
  0x52   : > { %589 = vsyncadd (%p863_p6), %s173_s23, 4294967040  ;;  %v204_v0 = vld [vmem:[%s167_s3] sm:$0xff]  ;;  %v205_v1 = vld [vmem:[%s167_s3 + $0x8] sm:$0xff]  ;;  %vm248_vm0 = vcmask 7168   ;;  %v273_v54 = vlaneseq  ;;  %s406_s20 = sshll.u32 %s790_s30, 3  ;;  %s408_s5 = sshll.u32 %s651_s13, 7 }
  0x53   : > { %208 = vmax.xlane.f32.xlu0 %v204_v0  ;;  %v206_v2 = vld [vmem:[%s176_s29] sm:$0xff]  ;;  %v207_v12 = vld [vmem:[%s176_s29 + $0x8] sm:$0xff]  ;;  %s201_s14 = scalar_lea.vmem [#allocation7], %s406_s20  ;;  %s808_s27 = scalar_lea.hbm %s854_s2, %s408_s5 }
  0x54   : > { %v274_v55 = vshrl.u32 %v273_v54, 7  ;;  %v276_v56 = vand.u32 127, %v273_v54  ;;  %s301_s17 = sshll.u32 %s201_s14, 4  ;;  %s288_s13 = scalar_lea.sflag [#allocation4], %s790_s30  ;;  %s810_s17 = int_to_ptr.vmem [resolvable:$true] %s301_s17 }
  0x55   : > { %s538_s25 = scalar_lea.vmem %s810_s17, 128  ;;  %p864_p1 = scmp.ne.s32.totalorder %s859_s21, 0 }
  0x56   : > { %vm277_vm1 = vcmp.eq.s32.totalorder %v274_v55, 0  ;;  %vm280_vm2 = vcmp.eq.s32.totalorder %v276_v56, 1  ;;  %vm278_vm3 = vcmp.eq.s32.totalorder %v276_v56, 0  ;;  %p539_p13 = scmp.ne.s32.totalorder %s810_s17, %s538_s25  ;;  %s614_s7 = smov [#allocation7]  }
  0x57   : > { %210 = vmax.xlane.f32.xlu0 %v205_v1  ;;  %vm281_vm4 = vmand %vm277_vm1, %vm280_vm2  ;;  %s542_s8 = sshll.u32 %s614_s7, 4  ;;  %s543_s8 = int_to_ptr.vmem [resolvable:$false] %s542_s8 }
  0x58   : > { %vm279_vm5 = vmand %vm277_vm1, %vm278_vm3  ;;  %p540_p12 = pnand %p539_p13, %p864_p1  ;;  %s544_s16 = scalar_lea.vmem %s543_s8, 256 }
  0x59   : > { %p545_p5 = scmp.lt.s32.totalorder %s810_s17, %s543_s8  ;;  %p546_p7 = scmp.lt.s32.totalorder %s544_s16, %s538_s25 }
  0x5a   : > { %p541_p10 = pneg %p540_p12 }
  0x5b   : > { %236 = vadd.xlane.f32.xlu0 %v206_v2  ;;  %p547_p9 = por %p546_p7, %p545_p5 }
  0x5d   : > { %p548_p11 = pnand %p547_p9, %p541_p10 }
  0xe0   : > { %v209_v3 = vpop.xlane.xlu0 %208 }
  0xe1   : > { %v212_v4 = vsub.f32 %v204_v0, %v209_v3 }
  0xe3   : > { %226 = vadd.xlane.f32.xlu0 %v212_v4  ;;  %v214_v5 = vmul.f32 1.442695, %v212_v4  ;;  %v230_v8 = vmul.f32 %v212_v4, %v206_v2 }
  0xe4   : > { %v211_v6 = vpop.xlane.xlu0 %210 }
  0xe5   : > { %v213_v7 = vsub.f32 %v205_v1, %v211_v6  ;;  %470 = vpow2.f32 %v214_v5 }
  0xe7   : > { %v216_v9 = vmul.f32 1.442695, %v213_v7  ;;  %232 = vadd.xlane.f32.xlu0 %v230_v8  ;;  %v231_v13 = vmul.f32 %v213_v7, %v207_v12 }
  0xe8   : > { %v237_v16 = vpop.xlane.xlu0 %236 }
  0xe9   : > { %472 = vpow2.f32 %v216_v9 }
  0xef   : > { %v471_v10 = vpop.eup %470 }
  0xf0   : > { %218 = vadd.xlane.f32.xlu1 %v471_v10 }
  0xf3   : > { %v473_v11 = vpop.eup %472 }
  0xf4   : > { %220 = vadd.xlane.f32.xlu1 %v473_v11 }
  0xf8   : > { %238 = vadd.xlane.f32.xlu1 %v207_v12 }
  0xfc   : > { %228 = vadd.xlane.f32.xlu1 %v213_v7 }
 0x100   : > { %234 = vadd.xlane.f32.xlu1 %v231_v13 }
 0x170   : > { %v227_v19 = vpop.xlane.xlu0 %226 }
 0x174   : > { %v233_v26 = vpop.xlane.xlu0 %232 }
 0x17d   : > { %v219_v14 = vpop.xlane.xlu1 %218 }
 0x17e   : > { %474 = vlog2.f32 %v219_v14 }
 0x181   : > { %v221_v15 = vpop.xlane.xlu1 %220 }
 0x182   : > { %476 = vlog2.f32 %v221_v15 }
 0x185   : > { %v239_v17 = vpop.xlane.xlu1 %238 }
 0x188   : > { %v475_v18 = vpop.eup %474 }
 0x189   : > { %v223_v20 = vmul.f32 0.6931472, %v475_v18  ;;  %v229_v21 = vpop.xlane.xlu1 %228 }
 0x18b   : > { %v240_v22 = vmul.f32 %v237_v16, %v223_v20  ;;  %v244_v23 = vmul.f32 128.0, %v223_v20 }
 0x18c   : > { %v477_v24 = vpop.eup %476 }
 0x18d   : > { %v225_v25 = vmul.f32 0.6931472, %v477_v24  ;;  %v246_v29 = vsub.f32 %v227_v19, %v244_v23  ;;  %v242_v30 = vsub.f32 %v233_v26, %v240_v22  ;;  %v235_v31 = vpop.xlane.xlu1 %234 }
 0x18f   : > { %v241_v27 = vmul.f32 %v239_v17, %v225_v25  ;;  %v245_v28 = vmul.f32 128.0, %v225_v25  ;;  %v261_v34 = vsel %vm248_vm0, %v246_v29, 0.0  ;;  %v249_v36 = vsel %vm248_vm0, %v242_v30, 0.0 }
 0x191   : > { %v247_v32 = vsub.f32 %v229_v21, %v245_v28  ;;  %v243_v33 = vsub.f32 %v235_v31, %v241_v27 }
 0x193   : > { %v262_v35 = vsel %vm248_vm0, %v247_v32, 0.0  ;;  %v250_v37 = vsel %vm248_vm0, %v243_v33, 0.0 }
 0x194   : > { %v263_v38 = vadd.f32 %v262_v35, %v261_v34  ;;  %v251_v39 = vadd.f32 %v250_v37, %v249_v36 }
 0x196   : > { %264 = vadd.xlane.f32.xlu1 %v263_v38  ;;  %252 = vadd.xlane.f32.xlu0 %v251_v39 }
 0x223   : > { %v265_v40 = vpop.xlane.xlu1 %264  ;;  %v253_v41 = vpop.xlane.xlu0 %252 }
 0x224   : > { %v266_v42 = vrot.slane %v265_v40, 4  ;;  %v254_v43 = vrot.slane %v253_v41, 4 }
 0x226   : > { %v267_v44 = vadd.f32 %v266_v42, %v265_v40  ;;  %v255_v45 = vadd.f32 %v254_v43, %v253_v41 }
 0x228   : > { %v268_v46 = vrot.slane %v267_v44, 2  ;;  %v256_v47 = vrot.slane %v255_v45, 2 }
 0x22a   : > { %v269_v48 = vadd.f32 %v268_v46, %v267_v44  ;;  %v257_v49 = vadd.f32 %v256_v47, %v255_v45 }
 0x22c   : > { %v258_v50 = vrot.slane %v257_v49, 1  ;;  %v270_v51 = vrot.slane %v269_v48, 1 }
 0x22e   : > { %v259_v52 = vadd.f32 %v258_v50, %v257_v49  ;;  %v271_v53 = vadd.f32 %v270_v51, %v269_v48 }
 0x230   : > { %413 = vpush %v259_v52 }
 0x231   : > { %415 = vpush %v271_v53 }
 0x261   : > { %s414_s6 = spop %413 }
 0x262   : > { %v284_v57 = vstv %s414_s6  ;;  %s416_s28 = spop %415 }
 0x263   : > { %v282_v58 = vstv %s416_s28 }
 0x264   : > { %v283_v59 = vsel %vm281_vm4, %v282_v58, 0.0 }
 0x265   : > { %v285_v60 = vsel %vm279_vm5, %v284_v57, %v283_v59 }
 0x266   : > { %286 = vst [vmem:[%s201_s14] sm:$0xff] %v285_v60 }
 0x267   : > { %551 = shalt.err (!%p548_p11)
}
 0x268   : > { %s552_s30 = scalar_lea.hbm %s808_s27, 128  ;;  %s556_s3 = scalar_lea.hbm %s854_s2, 256 }
 0x269   : > { %p553_p3 = scmp.ne.s32.totalorder %s808_s27, %s552_s30  ;;  %p557_p2 = scmp.lt.u32.totalorder %s808_s27, %s854_s2 }
 0x26a   : > { %p558_p4 = scmp.lt.u32.totalorder %s556_s3, %s552_s30  ;;  %p560_p13 = scmp.lt.u32.totalorder %s552_s30, %s808_s27 }
 0x26b   : > { %p554_p8 = pnand %p553_p3, %p864_p1 }
 0x26c   : > { %p559_p6 = por %p558_p4, %p557_p2 }
 0x26d   : > { %p555_p0 = pneg %p554_p8 }
 0x26e   : > { %p561_p12 = por %p560_p13, %p559_p6 }
 0x270   : > { %p562_p10 = pnand %p561_p12, %p555_p0 }
 0x272   : > { %565 = shalt.err (!%p562_p10)
}
 0x273   : > { %421 = dma.vmem_to_hbm [thread:$0]  (%p864_p1), %s810_s17, 128, %s808_s27, %s288_s13  }
 0x274 PF: > { %s313_s20 = sand.u32 1, %s596_s9   ;;  %p865_p5 = scmp.ne.s32.totalorder %s860_s22, 0 }
 0x275   : > { %p866_p7 = scmp.ge.s32.totalorder %s608_s12, 2  ;;  %s314_s5 = scalar_lea.sflag [#allocation4], %s313_s20 }
 0x277   : > { %p431_p9 = pnand %p866_p7, %p865_p5 }
 0x279   : > { %591 = dma.done.wait (!%p431_p9), %s314_s5, 128  }
 0x27a   : > { %593 = vsyncadd (!%p431_p9), %s314_s5, 4294967168  ;;  %p18_p11 = scmp.ge.s32.totalorder %s655_s15, 4   ;;  %s867_s9 = smov %s600_s10 }
 0x27b   : > { %s868_s10 = smov %s604_s11  ;;  %s869_s11 = smov %s667_s18 }
 0x27c   : > { %s870_s12 = smov %s655_s15  ;;  %20 = sbr.rel (!%p18_p11) target bundleno = 7 (0x7), region = 86 }
 0x283   :  { %319 = vsyncpa [#allocation3], 1 }
 0x284   :  { %321 = vsyncpa [#allocation3 + $0x1], 1 }
 0x285   :  { %322 = vsyncpa [#allocation6], 1 }
 0x286   :  { %324 = vsyncpa [#allocation6 + $0x1], 1 }
 0x287   :  { %325 = vsyncpa [#allocation4], 1 }
 0x288   :  { %327 = vsyncpa [#allocation4 + $0x1], 1 }

</bundles_post_ra>
